<compile_context>
chip_gen: v5e
topology: v5e:2x2
jax: 0.10.0
libtpu: 0.0.40
codegen_flags: <defaults>
</compile_context>

<pallas_src>
import jax
import jax.numpy as jnp
import numpy as np
from jax.experimental import pallas as pl
from jax.experimental.pallas import tpu as pltpu

K_HOPS = 3      # PyG TAGConv default K=3 (K+1 linear maps per layer)
N_HOPS = 2 * K_HOPS   # 3 prior hops + 3 learned hops


# ----------------------------- Pallas kernel -------------------------------

def tag_merge_kernel(x_ref, a_ref, pool_ref, w1_ref, w2_ref, w3_ref,
                     b1_ref, b2_ref, b3_ref, out_ref):
    # x_ref:    [N, F]      f32  node features
    # a_ref:    [6N, N]     f32  block-rows [A_p; A_p^2; A_p^3; A_l; A_l^2; A_l^3]
    # pool_ref: [B, N]      f32  global-mean-pool matrix
    # w1_ref:   [7, F, 8]   f32  layer-1 per-hop weights (idx 0 = self hop)
    # w2_ref:   [7, 8, 16]  f32  layer-2 per-hop weights (idx 0 = self hop)
    # w3_ref:   [16, 2]     f32  [fcw; fcw] row-stack (sums the two branches)
    # b1_ref:   [N, 8]      f32  pre-broadcast layer-1 bias [bp1 | bl1]
    # b2_ref:   [N, 16]     f32  pre-broadcast layer-2 bias [bp2 | bl2]
    # b3_ref:   [B, 2]      f32  pre-broadcast fc bias
    # out_ref:  [B, 2]      f32
    N, _ = x_ref.shape
    x = x_ref[...]                                                    # [N, F]
    a = a_ref[...]                                                    # [6N, N]

    # ---- layer 1: one block-row matmul for all 6 hop products, then accumulate ----
    h1 = jnp.dot(a, x, preferred_element_type=jnp.float32)            # [6N, F]
    y1 = jnp.dot(x, w1_ref[0], preferred_element_type=jnp.float32)    # self hop
    for j in range(N_HOPS):                                           # static unroll
        y1 = y1 + jnp.dot(h1[j * N:(j + 1) * N, :], w1_ref[j + 1],
                          preferred_element_type=jnp.float32)
    y1 = jnp.maximum(y1 + b1_ref[...], 0.0)                           # [N, 8]

    # ---- layer 2: same structure on y1 (cols 0:4 prior branch, 4:8 learned) ----
    h2 = jnp.dot(a, y1, preferred_element_type=jnp.float32)           # [6N, 8]
    y2 = jnp.dot(y1, w2_ref[0], preferred_element_type=jnp.float32)
    for j in range(N_HOPS):
        y2 = y2 + jnp.dot(h2[j * N:(j + 1) * N, :], w2_ref[j + 1],
                          preferred_element_type=jnp.float32)
    y2 = jnp.maximum(y2 + b2_ref[...], 0.0)                           # [N, 16]

    # ---- fc + pool + branch-sum, fused ----
    # w3 = [fcw; fcw], so y2 @ w3 == y2[:, 0:8] @ fcw + y2[:, 8:16] @ fcw.
    z = jnp.dot(y2, w3_ref[...], preferred_element_type=jnp.float32)  # [N, 2]
    out_ref[...] = (jnp.dot(pool_ref[...], z, preferred_element_type=jnp.float32)
                    + b3_ref[...])                                    # [B, 2]


def tag_merge_forward(x, a2d, pool, w1, w2, w3, b1, b2, b3):
    B = pool.shape[0]
    vmem = pl.BlockSpec(memory_space=pltpu.MemorySpace.VMEM)
    return pl.pallas_call(
        tag_merge_kernel,
        out_shape=jax.ShapeDtypeStruct((B, 2), jnp.float32),
        in_specs=[vmem] * 9,
        out_specs=vmem,
    )(x, a2d, pool, w1, w2, w3, b1, b2, b3)


# --------------------- one-time packing / precompute ------------------------

def stack_adjacency_powers(a_prior, a_learn):
    """[A_p; A_p^2; A_p^3; A_l; A_l^2; A_l^3] block-rows -> [6N, N] f32.
    Powers computed in float64 (setup glue) so the kernel is the only rounding source."""
    ap = np.asarray(a_prior, np.float64)
    al = np.asarray(a_learn, np.float64)
    blocks = [ap, ap @ ap, ap @ ap @ ap, al, al @ al, al @ al @ al]
    return jnp.asarray(np.concatenate(blocks, axis=0), jnp.float32)


def pack_params(params, num_features, num_nodes, num_graphs):
    """Lane-aligned per-layer weight tensors + pre-broadcast biases (all f32)."""
    (wp1, bp1, wp2, bp2, wl1, bl1, wl2, bl2, fcw, fcb) = [
        np.asarray(p, np.float32) for p in params]
    F = num_features

    # layer 1: index 0 = self hop (both branches), 1..3 prior hops, 4..6 learned hops
    w1 = np.zeros((N_HOPS + 1, F, 8), np.float32)
    w1[0, :, 0:4] = wp1[0]
    w1[0, :, 4:8] = wl1[0]
    for k in range(1, K_HOPS + 1):
        w1[k, :, 0:4] = wp1[k]
        w1[K_HOPS + k, :, 4:8] = wl1[k]

    # layer 2: input y1 has cols 0:4 prior / 4:8 learned; output cols 0:8 / 8:16
    w2 = np.zeros((N_HOPS + 1, 8, 16), np.float32)
    w2[0, 0:4, 0:8] = wp2[0]
    w2[0, 4:8, 8:16] = wl2[0]
    for k in range(1, K_HOPS + 1):
        w2[k, 0:4, 0:8] = wp2[k]
        w2[K_HOPS + k, 4:8, 8:16] = wl2[k]

    # fc: row-stack so one matmul sums the prior + learned branches
    w3 = np.concatenate([fcw, fcw], axis=0)                       # [16, 2]

    # biases pre-broadcast to full row count (no sublane broadcast in-kernel)
    b1 = np.broadcast_to(np.concatenate([bp1, bl1], axis=1), (num_nodes, 8)).copy()
    b2 = np.broadcast_to(np.concatenate([bp2, bl2], axis=1), (num_nodes, 16)).copy()
    b3 = np.broadcast_to(fcb, (num_graphs, 2)).copy()
    return tuple(jnp.asarray(a, jnp.float32) for a in (w1, w2, w3, b1, b2, b3))


# ------------------------------ JAX glue ------------------------------------

def gcn_norm_dense(edge_index, edge_weight, num_nodes):
    """PyG gcn_norm (add_self_loops=False) as a dense matrix.
    A[dst, src] = deg(src)^-1/2 * w * deg(dst)^-1/2, deg = weighted in-degree."""
    row, col = edge_index[0], edge_index[1]          # (source, target)
    ew = edge_weight.reshape(-1).astype(jnp.float32)
    deg = jnp.zeros((num_nodes,), jnp.float32).at[col].add(ew)
    dis = jnp.where(deg > 0, jax.lax.rsqrt(jnp.maximum(deg, 1e-30)), 0.0)
    norm = dis[row] * ew * dis[col]
    a = jnp.zeros((num_nodes, num_nodes), jnp.float32).at[col, row].add(norm)
    return a


def mean_pool_matrix(batch, num_graphs, num_nodes):
    onehot = (batch[None, :] == jnp.arange(num_graphs)[:, None]).astype(jnp.float32)
    counts = jnp.maximum(onehot.sum(axis=1, keepdims=True), 1.0)
    return onehot / counts


def gen_edges_cg(num_channels):
    ei = [[i, j] for i in range(num_channels) for j in range(num_channels) if i != j]
    return np.asarray(ei, dtype=np.int64).T


def reference_forward_np(x, a_p, a_l, pool, params):
    """float64 numpy reference, mirrors the PyTorch forward exactly."""
    (wp1, bp1, wp2, bp2, wl1, bl1, wl2, bl2, fcw, fcb) = [
        np.asarray(p, np.float64) for p in params]
    x = np.asarray(x, np.float64)
    a_p = np.asarray(a_p, np.float64)
    a_l = np.asarray(a_l, np.float64)
    pool = np.asarray(pool, np.float64)

    def tagconv(h0, a, w, b):
        out = h0 @ w[0]
        h = h0
        for k in range(1, K_HOPS + 1):
            h = a @ h
            out = out + h @ w[k]
        return out + b

    relu = lambda v: np.maximum(v, 0.0)
    xp = relu(tagconv(x, a_p, wp1, bp1))
    xp = relu(tagconv(xp, a_p, wp2, bp2))
    xp = pool @ xp
    xl = relu(tagconv(x, a_l, wl1, bl1))
    xl = relu(tagconv(xl, a_l, wl2, bl2))
    xl = pool @ xl
    return (xp + xl) @ fcw + fcb


# -------------------------------- main ---------------------------------------

if __name__ == "__main__":
    num_features = 16
    channels = 8          # TAGMerge(num_features=16, channels=8)
    batch_size = 2
    N = batch_size * channels

    key = jax.random.PRNGKey(0)
    keys = jax.random.split(key, 12)

    # node features (data.x)
    x = jax.random.normal(keys[0], (N, num_features), dtype=jnp.float32)

    # prior edges (data.edge_index / data.edge_attr): bidirectional ring per graph
    src, dst = [], []
    for b in range(batch_size):
        base = b * channels
        for i in range(channels):
            j = (i + 1) % channels
            src += [base + i, base + j]
            dst += [base + j, base + i]
    edge_index_prior = jnp.array([src, dst], dtype=jnp.int32)
    E_prior = edge_index_prior.shape[1]
    edge_weight_prior = jax.random.uniform(keys[1], (E_prior,), jnp.float32, 0.5, 1.5)

    # learned edges: complete graph on `channels` nodes, tiled (NOT offset) per batch
    # sample, all-ones edge weights — exactly mirrors the PyTorch module's repeat().
    ei = gen_edges_cg(channels)
    edge_index_learn = jnp.array(np.tile(ei, (1, batch_size)), dtype=jnp.int32)
    edge_weight_learn = jnp.ones((edge_index_learn.shape[1], 1), jnp.float32)

    batch = jnp.repeat(jnp.arange(batch_size, dtype=jnp.int32), channels)

    # dense normalized adjacencies + global-mean-pool matrix (setup glue)
    a_prior = gcn_norm_dense(edge_index_prior, edge_weight_prior, N)
    a_learn = gcn_norm_dense(edge_index_learn, edge_weight_learn, N)
    pool = mean_pool_matrix(batch, batch_size, N)

    # deterministic parameter init (synthetic; shapes per module __init__)
    def winit(k, shape, scale=0.1):
        return scale * jax.random.normal(k, shape, dtype=jnp.float32)

    wp1 = winit(keys[2], (K_HOPS + 1, num_features, 4)); bp1 = winit(keys[3], (1, 4))
    wp2 = winit(keys[4], (K_HOPS + 1, 4, 8));            bp2 = winit(keys[5], (1, 8))
    wl1 = winit(keys[6], (K_HOPS + 1, num_features, 4)); bl1 = winit(keys[7], (1, 4))
    wl2 = winit(keys[8], (K_HOPS + 1, 4, 8));            bl2 = winit(keys[9], (1, 8))
    fcw = winit(keys[10], (8, 2));                       fcb = winit(keys[11], (1, 2))

    params = (wp1, bp1, wp2, bp2, wl1, bl1, wl2, bl2, fcw, fcb)

    # one-time precompute: block-row A-power stack + lane-aligned weights/biases
    a2d = stack_adjacency_powers(a_prior, a_learn)              # [6N, N] f32
    w1, w2, w3, b1, b2, b3 = pack_params(params, num_features, N, batch_size)

    out = tag_merge_forward(x, a2d, pool, w1, w2, w3, b1, b2, b3)
    out = jax.block_until_ready(out)
    assert out.shape == (batch_size, 2)

    ref = reference_forward_np(x, a_prior, a_learn, pool, params)
    # f32 kernel vs float64 reference — tighter than the old bf16 tolerance
    np.testing.assert_allclose(np.asarray(out), np.asarray(ref, np.float32),
                               rtol=5e-3, atol=5e-3)

    print("KERNEL_OK")
</pallas_src>

<mosaic_0001>
module attributes {stable_mosaic.version = 11 : i64} {
  func.func @tag_merge_kernel(%arg0: memref<16x16xf32, #tpu.memory_space<vmem>>, %arg1: memref<96x16xf32, #tpu.memory_space<vmem>>, %arg2: memref<2x16xf32, #tpu.memory_space<vmem>>, %arg3: memref<7x16x8xf32, #tpu.memory_space<vmem>>, %arg4: memref<7x8x16xf32, #tpu.memory_space<vmem>>, %arg5: memref<16x2xf32, #tpu.memory_space<vmem>>, %arg6: memref<16x8xf32, #tpu.memory_space<vmem>>, %arg7: memref<16x16xf32, #tpu.memory_space<vmem>>, %arg8: memref<2x2xf32, #tpu.memory_space<vmem>>, %arg9: memref<2x2xf32, #tpu.memory_space<vmem>>) attributes {dimension_semantics = [], scalar_prefetch = 0 : i64, scratch_operands = 0 : i64, tpu.core_type = #tpu.core_type<tc>} {
    %c0 = arith.constant 0 : index
    %c0_0 = arith.constant 0 : index
    %0 = vector.load %arg0[%c0, %c0_0] : memref<16x16xf32, #tpu.memory_space<vmem>>, vector<16x16xf32>
    %c0_1 = arith.constant 0 : index
    %c0_2 = arith.constant 0 : index
    %1 = vector.load %arg1[%c0_1, %c0_2] : memref<96x16xf32, #tpu.memory_space<vmem>>, vector<96x16xf32>
    %cst = arith.constant dense<0.000000e+00> : vector<96x16xf32>
    %2 = tpu.matmul %1, %0, %cst {dimension_numbers = #tpu.dot_dimension_numbers<[1], [0], [0], [1], [0, 0, 1, 1], [], []>} : vector<96x16xf32>, vector<16x16xf32>, vector<96x16xf32> -> vector<96x16xf32>
    %c0_3 = arith.constant 0 : index
    %c0_4 = arith.constant 0 : index
    %c0_5 = arith.constant 0 : index
    %3 = vector.load %arg3[%c0_3, %c0_4, %c0_5] : memref<7x16x8xf32, #tpu.memory_space<vmem>>, vector<1x16x8xf32>
    %4 = vector.shape_cast %3 : vector<1x16x8xf32> to vector<16x8xf32>
    %cst_6 = arith.constant dense<0.000000e+00> : vector<16x8xf32>
    %5 = tpu.matmul %0, %4, %cst_6 {dimension_numbers = #tpu.dot_dimension_numbers<[1], [0], [0], [1], [0, 0, 1, 1], [], []>} : vector<16x16xf32>, vector<16x8xf32>, vector<16x8xf32> -> vector<16x8xf32>
    %6 = vector.extract_strided_slice %2 {offsets = [0, 0], sizes = [16, 16], strides = [1, 1]} : vector<96x16xf32> to vector<16x16xf32>
    %c1 = arith.constant 1 : index
    %c0_7 = arith.constant 0 : index
    %c0_8 = arith.constant 0 : index
    %7 = vector.load %arg3[%c1, %c0_7, %c0_8] : memref<7x16x8xf32, #tpu.memory_space<vmem>>, vector<1x16x8xf32>
    %8 = vector.shape_cast %7 : vector<1x16x8xf32> to vector<16x8xf32>
    %cst_9 = arith.constant dense<0.000000e+00> : vector<16x8xf32>
    %9 = tpu.matmul %6, %8, %cst_9 {dimension_numbers = #tpu.dot_dimension_numbers<[1], [0], [0], [1], [0, 0, 1, 1], [], []>} : vector<16x16xf32>, vector<16x8xf32>, vector<16x8xf32> -> vector<16x8xf32>
    %10 = arith.addf %5, %9 : vector<16x8xf32>
    %11 = vector.extract_strided_slice %2 {offsets = [16, 0], sizes = [16, 16], strides = [1, 1]} : vector<96x16xf32> to vector<16x16xf32>
    %c2 = arith.constant 2 : index
    %c0_10 = arith.constant 0 : index
    %c0_11 = arith.constant 0 : index
    %12 = vector.load %arg3[%c2, %c0_10, %c0_11] : memref<7x16x8xf32, #tpu.memory_space<vmem>>, vector<1x16x8xf32>
    %13 = vector.shape_cast %12 : vector<1x16x8xf32> to vector<16x8xf32>
    %cst_12 = arith.constant dense<0.000000e+00> : vector<16x8xf32>
    %14 = tpu.matmul %11, %13, %cst_12 {dimension_numbers = #tpu.dot_dimension_numbers<[1], [0], [0], [1], [0, 0, 1, 1], [], []>} : vector<16x16xf32>, vector<16x8xf32>, vector<16x8xf32> -> vector<16x8xf32>
    %15 = arith.addf %10, %14 : vector<16x8xf32>
    %16 = vector.extract_strided_slice %2 {offsets = [32, 0], sizes = [16, 16], strides = [1, 1]} : vector<96x16xf32> to vector<16x16xf32>
    %c3 = arith.constant 3 : index
    %c0_13 = arith.constant 0 : index
    %c0_14 = arith.constant 0 : index
    %17 = vector.load %arg3[%c3, %c0_13, %c0_14] : memref<7x16x8xf32, #tpu.memory_space<vmem>>, vector<1x16x8xf32>
    %18 = vector.shape_cast %17 : vector<1x16x8xf32> to vector<16x8xf32>
    %cst_15 = arith.constant dense<0.000000e+00> : vector<16x8xf32>
    %19 = tpu.matmul %16, %18, %cst_15 {dimension_numbers = #tpu.dot_dimension_numbers<[1], [0], [0], [1], [0, 0, 1, 1], [], []>} : vector<16x16xf32>, vector<16x8xf32>, vector<16x8xf32> -> vector<16x8xf32>
    %20 = arith.addf %15, %19 : vector<16x8xf32>
    %21 = vector.extract_strided_slice %2 {offsets = [48, 0], sizes = [16, 16], strides = [1, 1]} : vector<96x16xf32> to vector<16x16xf32>
    %c4 = arith.constant 4 : index
    %c0_16 = arith.constant 0 : index
    %c0_17 = arith.constant 0 : index
    %22 = vector.load %arg3[%c4, %c0_16, %c0_17] : memref<7x16x8xf32, #tpu.memory_space<vmem>>, vector<1x16x8xf32>
    %23 = vector.shape_cast %22 : vector<1x16x8xf32> to vector<16x8xf32>
    %cst_18 = arith.constant dense<0.000000e+00> : vector<16x8xf32>
    %24 = tpu.matmul %21, %23, %cst_18 {dimension_numbers = #tpu.dot_dimension_numbers<[1], [0], [0], [1], [0, 0, 1, 1], [], []>} : vector<16x16xf32>, vector<16x8xf32>, vector<16x8xf32> -> vector<16x8xf32>
    %25 = arith.addf %20, %24 : vector<16x8xf32>
    %26 = vector.extract_strided_slice %2 {offsets = [64, 0], sizes = [16, 16], strides = [1, 1]} : vector<96x16xf32> to vector<16x16xf32>
    %c5 = arith.constant 5 : index
    %c0_19 = arith.constant 0 : index
    %c0_20 = arith.constant 0 : index
    %27 = vector.load %arg3[%c5, %c0_19, %c0_20] : memref<7x16x8xf32, #tpu.memory_space<vmem>>, vector<1x16x8xf32>
    %28 = vector.shape_cast %27 : vector<1x16x8xf32> to vector<16x8xf32>
    %cst_21 = arith.constant dense<0.000000e+00> : vector<16x8xf32>
    %29 = tpu.matmul %26, %28, %cst_21 {dimension_numbers = #tpu.dot_dimension_numbers<[1], [0], [0], [1], [0, 0, 1, 1], [], []>} : vector<16x16xf32>, vector<16x8xf32>, vector<16x8xf32> -> vector<16x8xf32>
    %30 = arith.addf %25, %29 : vector<16x8xf32>
    %31 = vector.extract_strided_slice %2 {offsets = [80, 0], sizes = [16, 16], strides = [1, 1]} : vector<96x16xf32> to vector<16x16xf32>
    %c6 = arith.constant 6 : index
    %c0_22 = arith.constant 0 : index
    %c0_23 = arith.constant 0 : index
    %32 = vector.load %arg3[%c6, %c0_22, %c0_23] : memref<7x16x8xf32, #tpu.memory_space<vmem>>, vector<1x16x8xf32>
    %33 = vector.shape_cast %32 : vector<1x16x8xf32> to vector<16x8xf32>
    %cst_24 = arith.constant dense<0.000000e+00> : vector<16x8xf32>
    %34 = tpu.matmul %31, %33, %cst_24 {dimension_numbers = #tpu.dot_dimension_numbers<[1], [0], [0], [1], [0, 0, 1, 1], [], []>} : vector<16x16xf32>, vector<16x8xf32>, vector<16x8xf32> -> vector<16x8xf32>
    %35 = arith.addf %30, %34 : vector<16x8xf32>
    %c0_25 = arith.constant 0 : index
    %c0_26 = arith.constant 0 : index
    %36 = vector.load %arg6[%c0_25, %c0_26] : memref<16x8xf32, #tpu.memory_space<vmem>>, vector<16x8xf32>
    %37 = arith.addf %35, %36 : vector<16x8xf32>
    %cst_27 = arith.constant 0.000000e+00 : f32
    %38 = vector.broadcast %cst_27 : f32 to vector<16x8xf32>
    %39 = arith.maximumf %37, %38 : vector<16x8xf32>
    %cst_28 = arith.constant dense<0.000000e+00> : vector<96x8xf32>
    %40 = tpu.matmul %1, %39, %cst_28 {dimension_numbers = #tpu.dot_dimension_numbers<[1], [0], [0], [1], [0, 0, 1, 1], [], []>} : vector<96x16xf32>, vector<16x8xf32>, vector<96x8xf32> -> vector<96x8xf32>
    %c0_29 = arith.constant 0 : index
    %c0_30 = arith.constant 0 : index
    %c0_31 = arith.constant 0 : index
    %41 = vector.load %arg4[%c0_29, %c0_30, %c0_31] : memref<7x8x16xf32, #tpu.memory_space<vmem>>, vector<1x8x16xf32>
    %42 = vector.shape_cast %41 : vector<1x8x16xf32> to vector<8x16xf32>
    %cst_32 = arith.constant dense<0.000000e+00> : vector<16x16xf32>
    %43 = tpu.matmul %39, %42, %cst_32 {dimension_numbers = #tpu.dot_dimension_numbers<[1], [0], [0], [1], [0, 0, 1, 1], [], []>} : vector<16x8xf32>, vector<8x16xf32>, vector<16x16xf32> -> vector<16x16xf32>
    %44 = vector.extract_strided_slice %40 {offsets = [0, 0], sizes = [16, 8], strides = [1, 1]} : vector<96x8xf32> to vector<16x8xf32>
    %c1_33 = arith.constant 1 : index
    %c0_34 = arith.constant 0 : index
    %c0_35 = arith.constant 0 : index
    %45 = vector.load %arg4[%c1_33, %c0_34, %c0_35] : memref<7x8x16xf32, #tpu.memory_space<vmem>>, vector<1x8x16xf32>
    %46 = vector.shape_cast %45 : vector<1x8x16xf32> to vector<8x16xf32>
    %cst_36 = arith.constant dense<0.000000e+00> : vector<16x16xf32>
    %47 = tpu.matmul %44, %46, %cst_36 {dimension_numbers = #tpu.dot_dimension_numbers<[1], [0], [0], [1], [0, 0, 1, 1], [], []>} : vector<16x8xf32>, vector<8x16xf32>, vector<16x16xf32> -> vector<16x16xf32>
    %48 = arith.addf %43, %47 : vector<16x16xf32>
    %49 = vector.extract_strided_slice %40 {offsets = [16, 0], sizes = [16, 8], strides = [1, 1]} : vector<96x8xf32> to vector<16x8xf32>
    %c2_37 = arith.constant 2 : index
    %c0_38 = arith.constant 0 : index
    %c0_39 = arith.constant 0 : index
    %50 = vector.load %arg4[%c2_37, %c0_38, %c0_39] : memref<7x8x16xf32, #tpu.memory_space<vmem>>, vector<1x8x16xf32>
    %51 = vector.shape_cast %50 : vector<1x8x16xf32> to vector<8x16xf32>
    %cst_40 = arith.constant dense<0.000000e+00> : vector<16x16xf32>
    %52 = tpu.matmul %49, %51, %cst_40 {dimension_numbers = #tpu.dot_dimension_numbers<[1], [0], [0], [1], [0, 0, 1, 1], [], []>} : vector<16x8xf32>, vector<8x16xf32>, vector<16x16xf32> -> vector<16x16xf32>
    %53 = arith.addf %48, %52 : vector<16x16xf32>
    %54 = vector.extract_strided_slice %40 {offsets = [32, 0], sizes = [16, 8], strides = [1, 1]} : vector<96x8xf32> to vector<16x8xf32>
    %c3_41 = arith.constant 3 : index
    %c0_42 = arith.constant 0 : index
    %c0_43 = arith.constant 0 : index
    %55 = vector.load %arg4[%c3_41, %c0_42, %c0_43] : memref<7x8x16xf32, #tpu.memory_space<vmem>>, vector<1x8x16xf32>
    %56 = vector.shape_cast %55 : vector<1x8x16xf32> to vector<8x16xf32>
    %cst_44 = arith.constant dense<0.000000e+00> : vector<16x16xf32>
    %57 = tpu.matmul %54, %56, %cst_44 {dimension_numbers = #tpu.dot_dimension_numbers<[1], [0], [0], [1], [0, 0, 1, 1], [], []>} : vector<16x8xf32>, vector<8x16xf32>, vector<16x16xf32> -> vector<16x16xf32>
    %58 = arith.addf %53, %57 : vector<16x16xf32>
    %59 = vector.extract_strided_slice %40 {offsets = [48, 0], sizes = [16, 8], strides = [1, 1]} : vector<96x8xf32> to vector<16x8xf32>
    %c4_45 = arith.constant 4 : index
    %c0_46 = arith.constant 0 : index
    %c0_47 = arith.constant 0 : index
    %60 = vector.load %arg4[%c4_45, %c0_46, %c0_47] : memref<7x8x16xf32, #tpu.memory_space<vmem>>, vector<1x8x16xf32>
    %61 = vector.shape_cast %60 : vector<1x8x16xf32> to vector<8x16xf32>
    %cst_48 = arith.constant dense<0.000000e+00> : vector<16x16xf32>
    %62 = tpu.matmul %59, %61, %cst_48 {dimension_numbers = #tpu.dot_dimension_numbers<[1], [0], [0], [1], [0, 0, 1, 1], [], []>} : vector<16x8xf32>, vector<8x16xf32>, vector<16x16xf32> -> vector<16x16xf32>
    %63 = arith.addf %58, %62 : vector<16x16xf32>
    %64 = vector.extract_strided_slice %40 {offsets = [64, 0], sizes = [16, 8], strides = [1, 1]} : vector<96x8xf32> to vector<16x8xf32>
    %c5_49 = arith.constant 5 : index
    %c0_50 = arith.constant 0 : index
    %c0_51 = arith.constant 0 : index
    %65 = vector.load %arg4[%c5_49, %c0_50, %c0_51] : memref<7x8x16xf32, #tpu.memory_space<vmem>>, vector<1x8x16xf32>
    %66 = vector.shape_cast %65 : vector<1x8x16xf32> to vector<8x16xf32>
    %cst_52 = arith.constant dense<0.000000e+00> : vector<16x16xf32>
    %67 = tpu.matmul %64, %66, %cst_52 {dimension_numbers = #tpu.dot_dimension_numbers<[1], [0], [0], [1], [0, 0, 1, 1], [], []>} : vector<16x8xf32>, vector<8x16xf32>, vector<16x16xf32> -> vector<16x16xf32>
    %68 = arith.addf %63, %67 : vector<16x16xf32>
    %69 = vector.extract_strided_slice %40 {offsets = [80, 0], sizes = [16, 8], strides = [1, 1]} : vector<96x8xf32> to vector<16x8xf32>
    %c6_53 = arith.constant 6 : index
    %c0_54 = arith.constant 0 : index
    %c0_55 = arith.constant 0 : index
    %70 = vector.load %arg4[%c6_53, %c0_54, %c0_55] : memref<7x8x16xf32, #tpu.memory_space<vmem>>, vector<1x8x16xf32>
    %71 = vector.shape_cast %70 : vector<1x8x16xf32> to vector<8x16xf32>
    %cst_56 = arith.constant dense<0.000000e+00> : vector<16x16xf32>
    %72 = tpu.matmul %69, %71, %cst_56 {dimension_numbers = #tpu.dot_dimension_numbers<[1], [0], [0], [1], [0, 0, 1, 1], [], []>} : vector<16x8xf32>, vector<8x16xf32>, vector<16x16xf32> -> vector<16x16xf32>
    %73 = arith.addf %68, %72 : vector<16x16xf32>
    %c0_57 = arith.constant 0 : index
    %c0_58 = arith.constant 0 : index
    %74 = vector.load %arg7[%c0_57, %c0_58] : memref<16x16xf32, #tpu.memory_space<vmem>>, vector<16x16xf32>
    %75 = arith.addf %73, %74 : vector<16x16xf32>
    %cst_59 = arith.constant 0.000000e+00 : f32
    %76 = vector.broadcast %cst_59 : f32 to vector<16x16xf32>
    %77 = arith.maximumf %75, %76 : vector<16x16xf32>
    %c0_60 = arith.constant 0 : index
    %c0_61 = arith.constant 0 : index
    %78 = vector.load %arg5[%c0_60, %c0_61] : memref<16x2xf32, #tpu.memory_space<vmem>>, vector<16x2xf32>
    %cst_62 = arith.constant dense<0.000000e+00> : vector<16x2xf32>
    %79 = tpu.matmul %77, %78, %cst_62 {dimension_numbers = #tpu.dot_dimension_numbers<[1], [0], [0], [1], [0, 0, 1, 1], [], []>} : vector<16x16xf32>, vector<16x2xf32>, vector<16x2xf32> -> vector<16x2xf32>
    %c0_63 = arith.constant 0 : index
    %c0_64 = arith.constant 0 : index
    %80 = vector.load %arg2[%c0_63, %c0_64] : memref<2x16xf32, #tpu.memory_space<vmem>>, vector<2x16xf32>
    %cst_65 = arith.constant dense<0.000000e+00> : vector<2x2xf32>
    %81 = tpu.matmul %80, %79, %cst_65 {dimension_numbers = #tpu.dot_dimension_numbers<[1], [0], [0], [1], [0, 0, 1, 1], [], []>} : vector<2x16xf32>, vector<16x2xf32>, vector<2x2xf32> -> vector<2x2xf32>
    %c0_66 = arith.constant 0 : index
    %c0_67 = arith.constant 0 : index
    %82 = vector.load %arg8[%c0_66, %c0_67] : memref<2x2xf32, #tpu.memory_space<vmem>>, vector<2x2xf32>
    %83 = arith.addf %81, %82 : vector<2x2xf32>
    %c0_68 = arith.constant 0 : index
    %c0_69 = arith.constant 0 : index
    %84 = vector.load %arg9[%c0_68, %c0_69] : memref<2x2xf32, #tpu.memory_space<vmem>>, vector<2x2xf32>
    tpu.vector_store %arg9[%c0_68, %c0_69], %83 {strides = array<i32>} : memref<2x2xf32, #tpu.memory_space<vmem>>, vector<2x2xf32>,
    return
  }
}

</mosaic_0001>

<bundles_post_ra>
// kernel: tpu_custom_call.1
= control target key start
LH: loop header
LB: loop body
LE: loop exit
PB: predicated region body
PF: predicated region fallthrough
CT: control target
= control target key end

     0   :  { %vm47_vm0 = vcmask 130048   ;;  %s1122_s0 = inlined_call_operand.vmem [shape: f32[16,16], index: 0, kind: input, shape index: {}]   ;;  %s1123_s1 = inlined_call_operand.vmem [shape: f32[96,16], index: 1, kind: input, shape index: {}]   ;;  %s1124_s2 = inlined_call_operand.vmem [shape: f32[2,16], index: 2, kind: input, shape index: {}]   ;;  %s1125_s3 = inlined_call_operand.vmem [shape: f32[7,16,8], index: 3, kind: input, shape index: {}]   ;;  %s1126_s4 = inlined_call_operand.vmem [shape: f32[7,8,16], index: 4, kind: input, shape index: {}]   ;;  %s1127_s5 = inlined_call_operand.vmem [shape: f32[16,2], index: 5, kind: input, shape index: {}]   ;;  %s1128_s6 = inlined_call_operand.vmem [shape: f32[16,8], index: 6, kind: input, shape index: {}]   ;;  %s1129_s7 = inlined_call_operand.vmem [shape: f32[16,16], index: 7, kind: input, shape index: {}]   ;;  %s1130_s8 = inlined_call_operand.vmem [shape: f32[2,2], index: 8, kind: input, shape index: {}]   ;;  %s1131_s9 = inlined_call_operand.hbm [shape: f32[2,2], index: 9, kind: output, shape index: {}]  }
   0x1   :  { %v34_v0 = vld [vmem:[%s1122_s0 + $0x8] sm:$0xff]  ;;  %v33_v1 = vld [vmem:[%s1122_s0] sm:$0xff] }
   0x2   :  { %98 = vmatpush.msra.mxu0 %v34_v0  ;;  %v896_v2 = vld [vmem:[%s1123_s1] sm:$0xff] }
   0x3   :  { %14 = vsyncpa [#allocation3], 0  ;;  %v903_v3 = vld [vmem:[%s1123_s1 + $0x8] sm:$0xff]  ;;  %v910_v4 = vld [vmem:[%s1123_s1 + $0x10] sm:$0xff]  ;;  %vm432_vm1 = vcmask 64512   ;;  %vm718_vm2 = vcmask 9216  }
   0x4   :  { %99 = vmatpush.msra.mxu0 %v33_v1  ;;  %v917_v5 = vld [vmem:[%s1123_s1 + $0x18] sm:$0xff]  ;;  %v924_v6 = vld [vmem:[%s1123_s1 + $0x20] sm:$0xff]  ;;  %v931_v7 = vld [vmem:[%s1123_s1 + $0x28] sm:$0xff] }
   0x5   :  { %736 = vmatmul.msk.f32.vlgmr.msra.gmra.mxu0 %vm47_vm0, %v896_v2  ;;  %v938_v8 = vld [vmem:[%s1123_s1 + $0x30] sm:$0xff]  ;;  %v945_v9 = vld [vmem:[%s1123_s1 + $0x38] sm:$0xff]  ;;  %v138_v10 = vld [vmem:[%s1125_s3 + $0x8] sm:$0xff] }
   0x6   :  { %v137_v11 = vld [vmem:[%s1125_s3] sm:$0xff]  ;;  %v749_v12 = vld [vmem:[%s1125_s3 + $0x18] sm:$0xff]  ;;  %191 = vmatpush.msra.mxu3 %v138_v10  ;;  %v970_v14 = vld [vmem:[%s1123_s1 + $0x48] sm:$0xff] }
   0x7   :  { %162 = vmatpush.msra.mxu1 %v749_v12  ;;  %v962_v13 = vld [vmem:[%s1123_s1 + $0x40] sm:$0xff]  ;;  %v977_v15 = vld [vmem:[%s1123_s1 + $0x50] sm:$0xff]  ;;  %v984_v16 = vld [vmem:[%s1123_s1 + $0x58] sm:$0xff] }
   0x8   :  { %192 = vmatpush.msra.mxu3 %v137_v11  ;;  %v748_v17 = vld [vmem:[%s1125_s3 + $0x10] sm:$0xff]  ;;  %v755_v18 = vld [vmem:[%s1125_s3 + $0x28] sm:$0xff]  ;;  %v754_v19 = vld [vmem:[%s1125_s3 + $0x20] sm:$0xff] }
   0x9   :  { %752 = vmatmul.msk.f32.vlgmr.msra.gmra.mxu3 %vm47_vm0, %v33_v1  ;;  %163 = vmatpush.msra.mxu1 %v748_v17  ;;  %v759_v20 = vld [vmem:[%s1125_s3 + $0x38] sm:$0xff]  ;;  %v758_v21 = vld [vmem:[%s1125_s3 + $0x30] sm:$0xff]  ;;  %v763_v24 = vld [vmem:[%s1125_s3 + $0x48] sm:$0xff] }
   0xa   :  { %223 = vmatpush.msrb.mxu3 %v755_v18  ;;  %291 = vmatpush.msra.mxu2 %v763_v24  ;;  %v762_v25 = vld [vmem:[%s1125_s3 + $0x40] sm:$0xff]  ;;  %v767_v28 = vld [vmem:[%s1125_s3 + $0x58] sm:$0xff]  ;;  %v766_v29 = vld [vmem:[%s1125_s3 + $0x50] sm:$0xff] }
   0xb   :  { %257 = vmatpush.msrb.mxu1 %v759_v20  ;;  %v771_v32 = vld [vmem:[%s1125_s3 + $0x68] sm:$0xff]  ;;  %v770_v33 = vld [vmem:[%s1125_s3 + $0x60] sm:$0xff] }
   0xc   :  { %224 = vmatpush.msrb.mxu3 %v754_v19  ;;  %292 = vmatpush.msra.mxu2 %v762_v25  ;;  %v429_v43 = vld [vmem:[%s1126_s4] sm:$0xff]  ;;  %v371_v17 = vld [vmem:[%s1128_s6 + $0x8] sm:$0xff] }
   0xd   :  { %737 = vmatmul.msk.f32.gmra.mxu0 %vm47_vm0, %v903_v3  ;;  %258 = vmatpush.msrb.mxu1 %v758_v21  ;;  %v370_v58 = vld [vmem:[%s1128_s6] sm:$0xff]  ;;  %s727_s6 = sshll.u32 %s1131_s9, 4  ;;  %s728_s6 = int_to_ptr.hbm [resolvable:$true] %s727_s6 }
   0xe   :  { %325 = vmatpush.msra.mxu3 %v767_v28  ;;  %v662_v28 = vld [vmem:[%s1127_s5] sm:$0xff] }
  0x10   :  { %326 = vmatpush.msra.mxu3 %v766_v29 }
  0x11   :  { %753 = vmatmul.msk.f32.gmra.mxu3 %vm47_vm0, %v34_v0 }
  0x15   :  { %738 = vmatmul.msk.f32.gmra.mxu0 %vm47_vm0, %v910_v4 }
  0x1d   :  { %739 = vmatmul.msk.f32.gmra.mxu0 %vm47_vm0, %v917_v5 }
  0x25   :  { %740 = vmatmul.msk.f32.gmra.mxu0 %vm47_vm0, %v924_v6 }
  0x2d   :  { %741 = vmatmul.msk.f32.gmra.mxu0 %vm47_vm0, %v931_v7 }
  0x35   :  { %742 = vmatmul.msk.f32.gmra.mxu0 %vm47_vm0, %v938_v8 }
  0x3d   :  { %743 = vmatmul.msk.f32.gmra.mxu0 %vm47_vm0, %v945_v9 }
  0x45   :  { %744 = vmatmul.msk.f32.gmra.mxu0 %vm47_vm0, %v962_v13 }
  0x4d   :  { %745 = vmatmul.msk.f32.gmra.mxu0 %vm47_vm0, %v970_v14 }
  0x55   :  { %746 = vmatmul.msk.f32.gmra.mxu0 %vm47_vm0, %v977_v15 }
  0x5d   :  { %747 = vmatmul.msk.f32.gmra.mxu0 %vm47_vm0, %v984_v16 }
  0x82   :  { %v101_v22 = vpop.f32.mrf.mxu0 }
  0x83   :  { %750 = vmatmul.msk.f32.vlgmr.msra.gmra.mxu1 %vm47_vm0, %v101_v22 }
  0x84   :  { %359 = vmatpush.msra.mxu1 %v771_v32 }
  0x86   :  { %360 = vmatpush.msra.mxu1 %v770_v33 }
  0x8a   :  { %v104_v23 = vpop.f32.mrf.mxu0 }
  0x8b   :  { %751 = vmatmul.msk.f32.gmra.mxu1 %vm47_vm0, %v104_v23 }
  0x8c   :  { %v194_v40 = vpop.f32.mrf.mxu3 }
  0x92   :  { %v107_v26 = vpop.f32.mrf.mxu0 }
  0x93   :  { %756 = vmatmul.msk.f32.vlgmr.msrb.gmra.mxu3 %vm47_vm0, %v107_v26 }
  0x94   :  { %v197_v42 = vpop.f32.mrf.mxu3 }
  0x9a   :  { %v110_v27 = vpop.f32.mrf.mxu0 }
  0x9b   :  { %757 = vmatmul.msk.f32.gmra.mxu3 %vm47_vm0, %v110_v27  ;;  %v663_v27 = vld [vmem:[%s1127_s5 + $0x8] sm:$0xff] }
  0x9c   :  { %684 = vmatpush.msrb.mxu0 %v663_v27 }
  0x9e   :  { %685 = vmatpush.msrb.mxu0 %v662_v28 }
  0xa2   :  { %v113_v30 = vpop.f32.mrf.mxu0 }
  0xa3   :  { %760 = vmatmul.msk.f32.vlgmr.msrb.gmra.mxu1 %vm47_vm0, %v113_v30 }
  0xa4   :  { %483 = vmatpush.msrb.mxu1 %v429_v43 }
  0xaa   :  { %v116_v31 = vpop.f32.mrf.mxu0 }
  0xab   :  { %761 = vmatmul.msk.f32.gmra.mxu1 %vm47_vm0, %v116_v31 }
  0xb2   :  { %v119_v34 = vpop.f32.mrf.mxu0 }
  0xb3   :  { %764 = vmatmul.msk.f32.vlgmr.msra.gmra.mxu2 %vm47_vm0, %v119_v34 }
  0xba   :  { %v122_v35 = vpop.f32.mrf.mxu0 }
  0xbb   :  { %765 = vmatmul.msk.f32.gmra.mxu2 %vm47_vm0, %v122_v35 }
  0xc2   :  { %v125_v36 = vpop.f32.mrf.mxu0 }
  0xc3   :  { %768 = vmatmul.msk.f32.vlgmr.msra.gmra.mxu3 %vm47_vm0, %v125_v36 }
  0xca   :  { %v128_v37 = vpop.f32.mrf.mxu0 }
  0xcb   :  { %769 = vmatmul.msk.f32.gmra.mxu3 %vm47_vm0, %v128_v37 }
  0xd2   :  { %v131_v38 = vpop.f32.mrf.mxu0 }
  0xd3   :  { %772 = vmatmul.msk.f32.vlgmr.msra.gmra.mxu1 %vm47_vm0, %v131_v38 }
  0xda   :  { %v134_v39 = vpop.f32.mrf.mxu0 }
  0xdb   :  { %773 = vmatmul.msk.f32.gmra.mxu1 %vm47_vm0, %v134_v39 }
 0x100   :  { %v165_v41 = vpop.f32.mrf.mxu1 }
 0x101   :  { %v195_v48 = vadd.f32 %v194_v40, %v165_v41 }
 0x108   :  { %v168_v44 = vpop.f32.mrf.mxu1 }
 0x109   :  { %v198_v55 = vadd.f32 %v197_v42, %v168_v44 }
 0x116   :  { %v226_v45 = vpop.f32.mrf.mxu3 }
 0x117   :  { %v232_v51 = vadd.f32 %v226_v45, %v195_v48 }
 0x11e   :  { %v229_v47 = vpop.f32.mrf.mxu3 }
 0x11f   :  { %v233_v59 = vadd.f32 %v229_v47, %v198_v55  ;;  %v656_v47 = vld [vmem:[%s1129_s7] sm:$0xff] }
 0x120   :  { %v260_v46 = vpop.f32.mrf.mxu1 }
 0x121   :  { %v266_v53 = vadd.f32 %v260_v46, %v232_v51 }
 0x128   :  { %v263_v49 = vpop.f32.mrf.mxu1 }
 0x129   :  { %v267_v62 = vadd.f32 %v263_v49, %v233_v59 }
 0x136   :  { %v294_v50 = vpop.f32.mrf.mxu2 }
 0x137   :  { %v300_v54 = vadd.f32 %v294_v50, %v266_v53 }
 0x13e   :  { %v297_v61 = vpop.f32.mrf.mxu2 }
 0x13f   :  { %v301_v1 = vadd.f32 %v297_v61, %v267_v62 }
 0x146   :  { %v328_v52 = vpop.f32.mrf.mxu3 }
 0x147   :  { %v334_v56 = vadd.f32 %v328_v52, %v300_v54 }
 0x14e   :  { %v331_v0 = vpop.f32.mrf.mxu3 }
 0x14f   :  { %v335_v11 = vadd.f32 %v331_v0, %v301_v1  ;;  %v694_v0 = vld [vmem:[%s1130_s8] sm:$0x3] }
 0x150   :  { %v362_v57 = vpop.f32.mrf.mxu1 }
 0x151   :  { %v368_v60 = vadd.f32 %v362_v57, %v334_v56  ;;  %v657_v57 = vld [vmem:[%s1129_s7 + $0x8] sm:$0xff]  ;;  %s836_s7 = smov [#allocation2]  }
 0x152   :  { %s725_s21 = sshll.u32 %s836_s7, 4  ;;  %s726_s21 = int_to_ptr.vmem [resolvable:$true] %s725_s21 }
 0x153   :  { %v372_v63 = vadd.f32 %v370_v58, %v368_v60 }
 0x155   :  { %v374_v10 = vmax.f32 %v372_v63, 0.0  ;;  %v693_v63 = vld [vmem:[%s1124_s2] sm:$0x3] }
 0x157   :  { %789 = vmatmul.msk.f32.vlgmr.msrb.gmra.mxu1 %vm432_vm1, %v374_v10 }
 0x158   :  { %v365_v12 = vpop.f32.mrf.mxu1 }
 0x159   :  { %v369_v18 = vadd.f32 %v365_v12, %v335_v11 }
 0x15b   :  { %v373_v19 = vadd.f32 %v371_v17, %v369_v18 }
 0x15d   :  { %v375_v20 = vmax.f32 %v373_v19, 0.0 }
 0x15f   :  { %390 = vmatpush.msrb.mxu2 %v375_v20  ;;  %790 = vmatmul.msk.f32.gmra.mxu1 %vm432_vm1, %v375_v20 }
 0x161   :  { %391 = vmatpush.msrb.mxu2 %v374_v10 }
 0x162   :  { %774 = vmatmul.msk.f32.vlgmr.msrb.gmra.mxu2 %vm47_vm0, %v896_v2  ;;  %v786_v2 = vld [vmem:[%s1126_s4 + $0x8] sm:$0xff] }
 0x163   :  { %454 = vmatpush.msrb.mxu3 %v786_v2 }
 0x16a   :  { %775 = vmatmul.msk.f32.gmra.mxu2 %vm47_vm0, %v903_v3  ;;  %v791_v3 = vld [vmem:[%s1126_s4 + $0x10] sm:$0xff] }
 0x16b   :  { %514 = vmatpush.msra.mxu3 %v791_v3 }
 0x172   :  { %776 = vmatmul.msk.f32.gmra.mxu2 %vm47_vm0, %v910_v4  ;;  %v794_v4 = vld [vmem:[%s1126_s4 + $0x18] sm:$0xff] }
 0x173   :  { %547 = vmatpush.msra.mxu1 %v794_v4 }
 0x17a   :  { %777 = vmatmul.msk.f32.gmra.mxu2 %vm47_vm0, %v917_v5 }
 0x182   :  { %778 = vmatmul.msk.f32.gmra.mxu2 %vm47_vm0, %v924_v6 }
 0x18a   :  { %779 = vmatmul.msk.f32.gmra.mxu2 %vm47_vm0, %v931_v7  ;;  %v797_v7 = vld [vmem:[%s1126_s4 + $0x20] sm:$0xff] }
 0x192   :  { %780 = vmatmul.msk.f32.gmra.mxu2 %vm47_vm0, %v938_v8 }
 0x19a   :  { %781 = vmatmul.msk.f32.gmra.mxu2 %vm47_vm0, %v945_v9 }
 0x1a2   :  { %782 = vmatmul.msk.f32.gmra.mxu2 %vm47_vm0, %v962_v13  ;;  %v800_v13 = vld [vmem:[%s1126_s4 + $0x28] sm:$0xff] }
 0x1a3   :  { %613 = vmatpush.msrb.mxu1 %v800_v13 }
 0x1aa   :  { %783 = vmatmul.msk.f32.gmra.mxu2 %vm47_vm0, %v970_v14 }
 0x1b2   :  { %784 = vmatmul.msk.f32.gmra.mxu2 %vm47_vm0, %v977_v15 }
 0x1ba   :  { %785 = vmatmul.msk.f32.gmra.mxu2 %vm47_vm0, %v984_v16  ;;  %v803_v16 = vld [vmem:[%s1126_s4 + $0x30] sm:$0xff] }
 0x1d4   :  { %v485_v31 = vpop.f32.mrf.mxu1 }
 0x1dc   :  { %v488_v33 = vpop.f32.mrf.mxu1 }
 0x1e5   :  { %v393_v5 = vpop.f32.mrf.mxu2 }
 0x1e6   :  { %787 = vmatmul.msk.f32.vlgmr.msrb.gmra.mxu3 %vm432_vm1, %v393_v5 }
 0x1e7   :  { %580 = vmatpush.msrb.mxu3 %v797_v7 }
 0x1ed   :  { %v396_v6 = vpop.f32.mrf.mxu2 }
 0x1ee   :  { %788 = vmatmul.msk.f32.gmra.mxu3 %vm432_vm1, %v396_v6 }
 0x1f5   :  { %v399_v8 = vpop.f32.mrf.mxu2 }
 0x1f6   :  { %792 = vmatmul.msk.f32.vlgmr.msra.gmra.mxu3 %vm432_vm1, %v399_v8 }
 0x1f7   :  { %646 = vmatpush.msra.mxu3 %v803_v16 }
 0x1fd   :  { %v402_v9 = vpop.f32.mrf.mxu2 }
 0x1fe   :  { %793 = vmatmul.msk.f32.gmra.mxu3 %vm432_vm1, %v402_v9 }
 0x205   :  { %v405_v14 = vpop.f32.mrf.mxu2 }
 0x206   :  { %795 = vmatmul.msk.f32.vlgmr.msra.gmra.mxu1 %vm432_vm1, %v405_v14 }
 0x20d   :  { %v408_v15 = vpop.f32.mrf.mxu2 }
 0x20e   :  { %796 = vmatmul.msk.f32.gmra.mxu1 %vm432_vm1, %v408_v15 }
 0x215   :  { %v411_v21 = vpop.f32.mrf.mxu2 }
 0x216   :  { %798 = vmatmul.msk.f32.vlgmr.msrb.gmra.mxu3 %vm432_vm1, %v411_v21 }
 0x21d   :  { %v414_v22 = vpop.f32.mrf.mxu2 }
 0x21e   :  { %799 = vmatmul.msk.f32.gmra.mxu3 %vm432_vm1, %v414_v22 }
 0x225   :  { %v417_v23 = vpop.f32.mrf.mxu2 }
 0x226   :  { %801 = vmatmul.msk.f32.vlgmr.msrb.gmra.mxu1 %vm432_vm1, %v417_v23 }
 0x22d   :  { %v420_v24 = vpop.f32.mrf.mxu2 }
 0x22e   :  { %802 = vmatmul.msk.f32.gmra.mxu1 %vm432_vm1, %v420_v24 }
 0x235   :  { %v423_v25 = vpop.f32.mrf.mxu2 }
 0x236   :  { %804 = vmatmul.msk.f32.vlgmr.msra.gmra.mxu3 %vm432_vm1, %v423_v25 }
 0x23d   :  { %v426_v26 = vpop.f32.mrf.mxu2 }
 0x23e   :  { %805 = vmatmul.msk.f32.gmra.mxu3 %vm432_vm1, %v426_v26 }
 0x269   :  { %v456_v29 = vpop.f32.mrf.mxu3 }
 0x26a   :  { %v486_v38 = vadd.f32 %v485_v31, %v456_v29 }
 0x271   :  { %v459_v30 = vpop.f32.mrf.mxu3 }
 0x272   :  { %v489_v44 = vadd.f32 %v488_v33, %v459_v30 }
 0x279   :  { %v516_v32 = vpop.f32.mrf.mxu3 }
 0x27a   :  { %v522_v40 = vadd.f32 %v516_v32, %v486_v38 }
 0x281   :  { %v519_v34 = vpop.f32.mrf.mxu3 }
 0x282   :  { %v523_v48 = vadd.f32 %v519_v34, %v489_v44 }
 0x283   :  { %v549_v35 = vpop.f32.mrf.mxu1 }
 0x284   :  { %v555_v42 = vadd.f32 %v549_v35, %v522_v40 }
 0x28b   :  { %v552_v37 = vpop.f32.mrf.mxu1 }
 0x28c   :  { %v556_v50 = vadd.f32 %v552_v37, %v523_v48 }
 0x299   :  { %v582_v36 = vpop.f32.mrf.mxu3 }
 0x29a   :  { %v588_v43 = vadd.f32 %v582_v36, %v555_v42 }
 0x2a1   :  { %v585_v39 = vpop.f32.mrf.mxu3 }
 0x2a2   :  { %v589_v53 = vadd.f32 %v585_v39, %v556_v50 }
 0x2a3   :  { %v615_v41 = vpop.f32.mrf.mxu1 }
 0x2a4   :  { %v621_v45 = vadd.f32 %v615_v41, %v588_v43 }
 0x2ab   :  { %v618_v52 = vpop.f32.mrf.mxu1 }
 0x2ac   :  { %v622_v55 = vadd.f32 %v618_v52, %v589_v53 }
 0x2b9   :  { %v648_v46 = vpop.f32.mrf.mxu3 }
 0x2ba   :  { %v654_v49 = vadd.f32 %v648_v46, %v621_v45 }
 0x2bc   :  { %v658_v51 = vadd.f32 %v656_v47, %v654_v49 }
 0x2be   :  { %v660_v54 = vmax.f32 %v658_v51, 0.0 }
 0x2c0   :  { %806 = vmatmul.msk.f32.vlgmr.msrb.gmra.mxu0 %vm47_vm0, %v660_v54 }
 0x2c1   :  { %v651_v56 = vpop.f32.mrf.mxu3 }
 0x2c2   :  { %v655_v58 = vadd.f32 %v651_v56, %v622_v55 }
 0x2c4   :  { %v659_v59 = vadd.f32 %v657_v57, %v655_v58 }
 0x2c6   :  { %v661_v60 = vmax.f32 %v659_v59, 0.0 }
 0x2c8   :  { %807 = vmatmul.msk.f32.gmra.mxu0 %vm47_vm0, %v661_v60 }
 0x33d   :  { %v687_v61 = vpop.f32.mrf.mxu0 }
 0x345   :  { %v690_v62 = vpop.f32.mrf.mxu0 }
 0x346   :  { %712 = vmatpush.msra.mxu1 %v690_v62 }
 0x348   :  { %713 = vmatpush.msra.mxu1 %v687_v61 }
 0x349   :  { %808 = vmatmul.msk.f32.vlgmr.msra.gmra.mxu1 %vm47_vm0, %v693_v63 }
 0x3c6   :  { %v715_v1 = vpop.f32.mrf.mxu1 }
 0x3c7   :  { %v716_v10 = vadd.f32 %v715_v1, %v694_v0 }
 0x3c9   :  { %719 = vst.msk [vmem:[#allocation2] sm:$0x3] %vm718_vm2, %v716_v10 }
 0x3ca   :  { %730 = dma.vmem_to_hbm [thread:$0]  %s726_s21, 32, %s728_s6, [#allocation3]  }
 0x3cb   :  { %834 = dma.done.wait [#allocation3], 32  }
 0x3cc   :  { %835 = vsyncadd [#allocation3], 4294967264 }
 0x3cd   :  { %735 = vsyncpa [#allocation3], 1 }

</bundles_post_ra>
